<compile_context>
chip_gen: v7x
topology: tpu7x:2x2x1
jax: 0.10.0
libtpu: 0.0.40
codegen_flags: <defaults>
</compile_context>

<pallas_src>
import functools

import jax
import jax.numpy as jnp
from jax.experimental import pallas as pl
from jax.experimental.pallas import tpu as pltpu

_LANE = 128
_SUBLANE = 8
_TB_MAX = 1024
_NEG_INF = -1e30  # padded-atom bias: exp(pad - max) == 0.0 in f32


def _round_up(x, m):
    return ((x + m - 1) // m) * m


def _bias_layout(widths):
    """Lane-aligned offsets for packing several (1, w) biases into one buffer."""
    offsets = []
    off = 0
    for w in widths:
        offsets.append(off)
        off = _round_up(off + w, _LANE)
    return tuple(offsets), off


def _c51_kernel(n_actions, atoms_pad, bias_slices,
                x_ref, w1_ref, w2_ref, w3_ref, w4_ref, b_ref, out_ref):
    (o1, n1), (o2, n2), (o3, n3), (o4, n4) = bias_slices

    x = x_ref[...]                                        # bf16 activations

    # fc1 -> relu      (bf16 MXU inputs, f32 accumulation, f32 bias/relu)
    h = jnp.dot(x, w1_ref[...], preferred_element_type=jnp.float32)
    h = jnp.maximum(h + b_ref[:, o1:o1 + n1], 0.0)
    # fc2 -> relu
    h = jnp.dot(h.astype(jnp.bfloat16), w2_ref[...],
                preferred_element_type=jnp.float32)
    h = jnp.maximum(h + b_ref[:, o2:o2 + n2], 0.0)
    # fc3 -> relu
    h = jnp.dot(h.astype(jnp.bfloat16), w3_ref[...],
                preferred_element_type=jnp.float32)
    h = jnp.maximum(h + b_ref[:, o3:o3 + n3], 0.0)
    # probs head: (tb, n_actions * atoms_pad); padded atom columns -> -1e30 (f32 add)
    logits = jnp.dot(h.astype(jnp.bfloat16), w4_ref[...],
                     preferred_element_type=jnp.float32)
    logits = logits + b_ref[:, o4:o4 + n4]

    # Per-action softmax over the lane-dense (128-wide) atoms axis.  Every slice
    # start is a multiple of 128 and every store is a full, unmasked (tb, 128)
    # store into the 2-D output block (batch rows on sublanes).
    for a in range(n_actions):
        la = logits[:, a * atoms_pad:(a + 1) * atoms_pad]
        m = jnp.max(la, axis=-1, keepdims=True)
        e = jnp.exp(la - m)                 # padded lanes: exp(-1e30 - m) == 0
        s = jnp.sum(e, axis=-1, keepdims=True)
        out_ref[:, a * atoms_pad:(a + 1) * atoms_pad] = e / s   # exact normalisation


def prepare_params(params, *, n_actions, n_atoms):
    """One-time parameter preprocessing: lane padding, bias packing, bf16 casts.

    Do this once and reuse the result; running it per forward call would put the
    pads / scatters back on the hot path.
    """
    w1, b1, w2, b2, w3, b3, w4, b4 = params
    atoms_pad = _round_up(n_atoms, _LANE)

    # probs head lane padding: zero weight columns, -1e30 bias columns so padded
    # atoms come out of the softmax as exactly 0.
    w4p = jnp.pad(
        w4.reshape(-1, n_actions, n_atoms),
        ((0, 0), (0, 0), (0, atoms_pad - n_atoms)),
    ).reshape(-1, n_actions * atoms_pad)
    b4p = jnp.pad(
        b4.reshape(1, n_actions, n_atoms),
        ((0, 0), (0, 0), (0, atoms_pad - n_atoms)),
        constant_values=_NEG_INF,
    ).reshape(1, n_actions * atoms_pad)

    # pack all biases into one lane-aligned f32 buffer (fewer tiny HBM->VMEM DMAs)
    bias_srcs = (b1, b2, b3, b4p)
    widths = tuple(int(b.shape[-1]) for b in bias_srcs)
    offsets, total = _bias_layout(widths)
    b_all = jnp.zeros((1, total), jnp.float32)
    for o, b in zip(offsets, bias_srcs):
        b_all = b_all.at[:, o:o + b.shape[-1]].set(
            b.reshape(1, -1).astype(jnp.float32))

    to_bf16 = lambda w: w.astype(jnp.bfloat16)
    return (to_bf16(w1), to_bf16(w2), to_bf16(w3), to_bf16(w4p), b_all)


def categorical_dqn_forward(x, prepared, *, n_actions, n_atoms):
    """x: (B, state_dim) float32 -> probs: (B, n_actions, n_atoms) float32."""
    w1, w2, w3, w4p, b_all = prepared
    batch, state_dim = x.shape
    atoms_pad = w4p.shape[1] // n_actions
    head = n_actions * atoms_pad

    # Static bias layout (re-derived from shapes; shapes are static under jit).
    widths = (w1.shape[1], w2.shape[1], w3.shape[1], head)
    offsets, _ = _bias_layout(widths)
    bias_slices = tuple(zip(offsets, widths))

    # ---- batch tiling: sublane-aligned blocks, >=2 blocks when the batch allows
    # so the ("parallel",) grid axis can shard across both v7x TensorCores.
    pb8 = _round_up(batch, _SUBLANE)
    if pb8 <= 2 * _SUBLANE:
        tb = pb8                                     # tiny batch: one full block
    else:
        # 16-row alignment keeps bf16 activation windows tile-aligned.
        tb = min(_TB_MAX, _round_up(pl.cdiv(pb8, 2), 16))
    padded_b = _round_up(pb8, tb)

    x_b = x.astype(jnp.bfloat16)
    if padded_b != batch:
        x_b = jnp.pad(x_b, ((0, padded_b - batch), (0, 0)))

    h1, h2, h3 = w1.shape[1], w2.shape[1], w3.shape[1]
    flops = 2 * padded_b * (state_dim * h1 + h1 * h2 + h2 * h3 + h3 * head)
    bytes_accessed = (2 * (padded_b * state_dim + w1.size + w2.size + w3.size
                           + w4p.size)
                      + 4 * (b_all.size + padded_b * head))
    cost = pl.CostEstimate(flops=int(flops),
                           transcendentals=int(padded_b * head),
                           bytes_accessed=int(bytes_accessed))

    out = pl.pallas_call(
        functools.partial(_c51_kernel, n_actions, atoms_pad, bias_slices),
        out_shape=jax.ShapeDtypeStruct((padded_b, head), jnp.float32),
        grid=(padded_b // tb,),
        in_specs=[
            pl.BlockSpec((tb, state_dim), lambda i: (i, 0)),   # activations: tiled
            pl.BlockSpec(w1.shape, lambda i: (0, 0)),          # weights: VMEM-resident
            pl.BlockSpec(w2.shape, lambda i: (0, 0)),
            pl.BlockSpec(w3.shape, lambda i: (0, 0)),
            pl.BlockSpec(w4p.shape, lambda i: (0, 0)),
            pl.BlockSpec(b_all.shape, lambda i: (0, 0)),       # packed f32 biases
        ],
        out_specs=pl.BlockSpec((tb, head), lambda i: (i, 0)),  # 2-D, lane-dense
        compiler_params=pltpu.CompilerParams(
            dimension_semantics=("parallel",),
            vmem_limit_bytes=32 * 1024 * 1024),
        cost_estimate=cost,
    )(x_b, w1, w2, w3, w4p, b_all)

    # strip batch padding and padded atom lanes
    # TODO(synk): if profiling shows HBM writeback (not the vst slot) binds on
    # v5e/v6e, pad atoms to 64 instead of 128 to halve output bytes + exp count.
    out = out.reshape(padded_b, n_actions, atoms_pad)
    return out[:batch, :, :n_atoms]


def init_params(key, state_dim, n_actions, n_atoms):
    """Deterministic synthetic parameters (shapes mirror the PyTorch __init__)."""
    sizes = [(state_dim, 64), (64, 128), (128, 32), (32, n_actions * n_atoms)]
    params = []
    for i, (fan_in, fan_out) in enumerate(sizes):
        kw, kb, key = jax.random.split(jax.random.fold_in(key, i), 3)
        bound = 1.0 / jnp.sqrt(fan_in)
        w = jax.random.uniform(kw, (fan_in, fan_out), jnp.float32, -bound, bound)
        b = jax.random.uniform(kb, (1, fan_out), jnp.float32, -bound, bound)
        params += [w, b]
    return tuple(params)


def reference_forward(x, params, *, n_actions, n_atoms):
    w1, b1, w2, b2, w3, b3, w4, b4 = params
    h = jax.nn.relu(x @ w1 + b1)
    h = jax.nn.relu(h @ w2 + b2)
    h = jax.nn.relu(h @ w3 + b3)
    logits = (h @ w4 + b4).reshape(-1, n_actions, n_atoms)
    return jax.nn.softmax(logits, axis=-1)


if __name__ == "__main__":
    key = jax.random.PRNGKey(0)

    batch = 2
    state_dim = 8       # state_shape = (8,)
    n_actions = 4
    n_atoms = 51

    kx, kp = jax.random.split(key)
    x = jax.random.normal(kx, (batch, state_dim), dtype=jnp.float32)
    params = init_params(kp, state_dim, n_actions, n_atoms)

    # one-time parameter preprocessing (kept out of the per-call hot path)
    prepared = prepare_params(params, n_actions=n_actions, n_atoms=n_atoms)

    fwd = jax.jit(functools.partial(categorical_dqn_forward,
                                    n_actions=n_actions, n_atoms=n_atoms))
    probs = jax.block_until_ready(fwd(x, prepared))

    # sanity check against a pure-JAX f32 reference (tolerance accounts for bf16
    # matmul inputs with f32 accumulation)
    ref = reference_forward(x, params, n_actions=n_actions, n_atoms=n_atoms)
    assert probs.shape == (batch, n_actions, n_atoms)
    assert jnp.allclose(probs, ref, atol=5e-3, rtol=5e-3)
    # exact (non-approximate) softmax normalisation inside the kernel
    assert jnp.allclose(jnp.sum(probs, axis=-1), 1.0, atol=1e-4)

    print("KERNEL_OK")
</pallas_src>

<mosaic_0001>
module attributes {stable_mosaic.version = 11 : i64} {
  func.func @_c51_kernel(%arg0: i32, %arg1: memref<8x8xbf16, #tpu.memory_space<vmem>>, %arg2: memref<8x64xbf16, #tpu.memory_space<vmem>>, %arg3: memref<64x128xbf16, #tpu.memory_space<vmem>>, %arg4: memref<128x32xbf16, #tpu.memory_space<vmem>>, %arg5: memref<32x512xbf16, #tpu.memory_space<vmem>>, %arg6: memref<1x896xf32, #tpu.memory_space<vmem>>, %arg7: memref<8x512xf32, #tpu.memory_space<vmem>>) attributes {dimension_semantics = [#tpu.dimension_semantics<parallel>], iteration_bounds = array<i64: 1>, scalar_prefetch = 0 : i64, scratch_operands = 0 : i64, tpu.core_type = #tpu.core_type<tc>, window_params = [{transform_indices = @transform_0, window_bounds = array<i64: 8, 8>}, {pipeline_mode = #tpu.pipeline_mode<synchronous>, transform_indices = @transform_1, window_bounds = array<i64: 8, 64>}, {pipeline_mode = #tpu.pipeline_mode<synchronous>, transform_indices = @transform_2, window_bounds = array<i64: 64, 128>}, {pipeline_mode = #tpu.pipeline_mode<synchronous>, transform_indices = @transform_3, window_bounds = array<i64: 128, 32>}, {pipeline_mode = #tpu.pipeline_mode<synchronous>, transform_indices = @transform_4, window_bounds = array<i64: 32, 512>}, {pipeline_mode = #tpu.pipeline_mode<synchronous>, transform_indices = @transform_5, window_bounds = array<i64: 1, 896>}, {transform_indices = @transform_6, window_bounds = array<i64: 8, 512>}]} {
    %c0 = arith.constant 0 : index
    %c0_0 = arith.constant 0 : index
    %0 = vector.load %arg1[%c0, %c0_0] : memref<8x8xbf16, #tpu.memory_space<vmem>>, vector<8x8xbf16>
    %c0_1 = arith.constant 0 : index
    %c0_2 = arith.constant 0 : index
    %1 = vector.load %arg2[%c0_1, %c0_2] : memref<8x64xbf16, #tpu.memory_space<vmem>>, vector<8x64xbf16>
    %cst = arith.constant dense<0.000000e+00> : vector<8x64xf32>
    %2 = tpu.matmul %0, %1, %cst {dimension_numbers = #tpu.dot_dimension_numbers<[1], [0], [0], [1], [0, 0, 1, 1], [], []>} : vector<8x8xbf16>, vector<8x64xbf16>, vector<8x64xf32> -> vector<8x64xf32>
    %c0_3 = arith.constant 0 : index
    %c0_4 = arith.constant 0 : index
    %3 = vector.load %arg6[%c0_3, %c0_4] : memref<1x896xf32, #tpu.memory_space<vmem>>, vector<1x64xf32>
    %4 = vector.broadcast %3 : vector<1x64xf32> to vector<8x64xf32>
    %5 = arith.addf %2, %4 : vector<8x64xf32>
    %cst_5 = arith.constant 0.000000e+00 : f32
    %6 = vector.broadcast %cst_5 : f32 to vector<8x64xf32>
    %7 = arith.maximumf %5, %6 : vector<8x64xf32>
    %8 = arith.truncf %7 : vector<8x64xf32> to vector<8x64xbf16>
    %c0_6 = arith.constant 0 : index
    %c0_7 = arith.constant 0 : index
    %9 = vector.load %arg3[%c0_6, %c0_7] : memref<64x128xbf16, #tpu.memory_space<vmem>>, vector<64x128xbf16>
    %cst_8 = arith.constant dense<0.000000e+00> : vector<8x128xf32>
    %10 = tpu.matmul %8, %9, %cst_8 {dimension_numbers = #tpu.dot_dimension_numbers<[1], [0], [0], [1], [0, 0, 1, 1], [], []>} : vector<8x64xbf16>, vector<64x128xbf16>, vector<8x128xf32> -> vector<8x128xf32>
    %c0_9 = arith.constant 0 : index
    %c128 = arith.constant 128 : index
    %11 = vector.load %arg6[%c0_9, %c128] : memref<1x896xf32, #tpu.memory_space<vmem>>, vector<1x128xf32>
    %12 = vector.broadcast %11 : vector<1x128xf32> to vector<8x128xf32>
    %13 = arith.addf %10, %12 : vector<8x128xf32>
    %cst_10 = arith.constant 0.000000e+00 : f32
    %14 = vector.broadcast %cst_10 : f32 to vector<8x128xf32>
    %15 = arith.maximumf %13, %14 : vector<8x128xf32>
    %16 = arith.truncf %15 : vector<8x128xf32> to vector<8x128xbf16>
    %c0_11 = arith.constant 0 : index
    %c0_12 = arith.constant 0 : index
    %17 = vector.load %arg4[%c0_11, %c0_12] : memref<128x32xbf16, #tpu.memory_space<vmem>>, vector<128x32xbf16>
    %cst_13 = arith.constant dense<0.000000e+00> : vector<8x32xf32>
    %18 = tpu.matmul %16, %17, %cst_13 {dimension_numbers = #tpu.dot_dimension_numbers<[1], [0], [0], [1], [0, 0, 1, 1], [], []>} : vector<8x128xbf16>, vector<128x32xbf16>, vector<8x32xf32> -> vector<8x32xf32>
    %c0_14 = arith.constant 0 : index
    %c256 = arith.constant 256 : index
    %19 = vector.load %arg6[%c0_14, %c256] : memref<1x896xf32, #tpu.memory_space<vmem>>, vector<1x32xf32>
    %20 = vector.broadcast %19 : vector<1x32xf32> to vector<8x32xf32>
    %21 = arith.addf %18, %20 : vector<8x32xf32>
    %cst_15 = arith.constant 0.000000e+00 : f32
    %22 = vector.broadcast %cst_15 : f32 to vector<8x32xf32>
    %23 = arith.maximumf %21, %22 : vector<8x32xf32>
    %24 = arith.truncf %23 : vector<8x32xf32> to vector<8x32xbf16>
    %c0_16 = arith.constant 0 : index
    %c0_17 = arith.constant 0 : index
    %25 = vector.load %arg5[%c0_16, %c0_17] : memref<32x512xbf16, #tpu.memory_space<vmem>>, vector<32x512xbf16>
    %cst_18 = arith.constant dense<0.000000e+00> : vector<8x512xf32>
    %26 = tpu.matmul %24, %25, %cst_18 {dimension_numbers = #tpu.dot_dimension_numbers<[1], [0], [0], [1], [0, 0, 1, 1], [], []>} : vector<8x32xbf16>, vector<32x512xbf16>, vector<8x512xf32> -> vector<8x512xf32>
    %c0_19 = arith.constant 0 : index
    %c384 = arith.constant 384 : index
    %27 = vector.load %arg6[%c0_19, %c384] : memref<1x896xf32, #tpu.memory_space<vmem>>, vector<1x512xf32>
    %28 = vector.broadcast %27 : vector<1x512xf32> to vector<8x512xf32>
    %29 = arith.addf %26, %28 : vector<8x512xf32>
    %30 = vector.extract_strided_slice %29 {offsets = [0, 0], sizes = [8, 128], strides = [1, 1]} : vector<8x512xf32> to vector<8x128xf32>
    %cst_20 = arith.constant dense<0xFF800000> : vector<8xf32>
    %31 = vector.multi_reduction <maximumf>, %30, %cst_20 [1] : vector<8x128xf32> to vector<8xf32>
    %32 = vector.shape_cast %31 : vector<8xf32> to vector<8x1xf32>
    %33 = vector.broadcast %32 : vector<8x1xf32> to vector<8x128xf32>
    %34 = arith.subf %30, %33 : vector<8x128xf32>
    %35 = math.exp %34 : vector<8x128xf32>
    %cst_21 = arith.constant dense<0.000000e+00> : vector<8xf32>
    %36 = vector.multi_reduction <add>, %35, %cst_21 [1] : vector<8x128xf32> to vector<8xf32>
    %37 = vector.shape_cast %36 : vector<8xf32> to vector<8x1xf32>
    %38 = vector.broadcast %37 : vector<8x1xf32> to vector<8x128xf32>
    %39 = arith.divf %35, %38 : vector<8x128xf32>
    %c0_22 = arith.constant 0 : index
    %c0_23 = arith.constant 0 : index
    %40 = vector.load %arg7[%c0_22, %c0_23] : memref<8x512xf32, #tpu.memory_space<vmem>>, vector<8x128xf32>
    tpu.vector_store %arg7[%c0_22, %c0_23], %39 {strides = array<i32>} : memref<8x512xf32, #tpu.memory_space<vmem>>, vector<8x128xf32>,
    %41 = vector.extract_strided_slice %29 {offsets = [0, 128], sizes = [8, 128], strides = [1, 1]} : vector<8x512xf32> to vector<8x128xf32>
    %cst_24 = arith.constant dense<0xFF800000> : vector<8xf32>
    %42 = vector.multi_reduction <maximumf>, %41, %cst_24 [1] : vector<8x128xf32> to vector<8xf32>
    %43 = vector.shape_cast %42 : vector<8xf32> to vector<8x1xf32>
    %44 = vector.broadcast %43 : vector<8x1xf32> to vector<8x128xf32>
    %45 = arith.subf %41, %44 : vector<8x128xf32>
    %46 = math.exp %45 : vector<8x128xf32>
    %cst_25 = arith.constant dense<0.000000e+00> : vector<8xf32>
    %47 = vector.multi_reduction <add>, %46, %cst_25 [1] : vector<8x128xf32> to vector<8xf32>
    %48 = vector.shape_cast %47 : vector<8xf32> to vector<8x1xf32>
    %49 = vector.broadcast %48 : vector<8x1xf32> to vector<8x128xf32>
    %50 = arith.divf %46, %49 : vector<8x128xf32>
    %c0_26 = arith.constant 0 : index
    %c128_27 = arith.constant 128 : index
    %51 = vector.load %arg7[%c0_26, %c128_27] : memref<8x512xf32, #tpu.memory_space<vmem>>, vector<8x128xf32>
    tpu.vector_store %arg7[%c0_26, %c128_27], %50 {strides = array<i32>} : memref<8x512xf32, #tpu.memory_space<vmem>>, vector<8x128xf32>,
    %52 = vector.extract_strided_slice %29 {offsets = [0, 256], sizes = [8, 128], strides = [1, 1]} : vector<8x512xf32> to vector<8x128xf32>
    %cst_28 = arith.constant dense<0xFF800000> : vector<8xf32>
    %53 = vector.multi_reduction <maximumf>, %52, %cst_28 [1] : vector<8x128xf32> to vector<8xf32>
    %54 = vector.shape_cast %53 : vector<8xf32> to vector<8x1xf32>
    %55 = vector.broadcast %54 : vector<8x1xf32> to vector<8x128xf32>
    %56 = arith.subf %52, %55 : vector<8x128xf32>
    %57 = math.exp %56 : vector<8x128xf32>
    %cst_29 = arith.constant dense<0.000000e+00> : vector<8xf32>
    %58 = vector.multi_reduction <add>, %57, %cst_29 [1] : vector<8x128xf32> to vector<8xf32>
    %59 = vector.shape_cast %58 : vector<8xf32> to vector<8x1xf32>
    %60 = vector.broadcast %59 : vector<8x1xf32> to vector<8x128xf32>
    %61 = arith.divf %57, %60 : vector<8x128xf32>
    %c0_30 = arith.constant 0 : index
    %c256_31 = arith.constant 256 : index
    %62 = vector.load %arg7[%c0_30, %c256_31] : memref<8x512xf32, #tpu.memory_space<vmem>>, vector<8x128xf32>
    tpu.vector_store %arg7[%c0_30, %c256_31], %61 {strides = array<i32>} : memref<8x512xf32, #tpu.memory_space<vmem>>, vector<8x128xf32>,
    %63 = vector.extract_strided_slice %29 {offsets = [0, 384], sizes = [8, 128], strides = [1, 1]} : vector<8x512xf32> to vector<8x128xf32>
    %cst_32 = arith.constant dense<0xFF800000> : vector<8xf32>
    %64 = vector.multi_reduction <maximumf>, %63, %cst_32 [1] : vector<8x128xf32> to vector<8xf32>
    %65 = vector.shape_cast %64 : vector<8xf32> to vector<8x1xf32>
    %66 = vector.broadcast %65 : vector<8x1xf32> to vector<8x128xf32>
    %67 = arith.subf %63, %66 : vector<8x128xf32>
    %68 = math.exp %67 : vector<8x128xf32>
    %cst_33 = arith.constant dense<0.000000e+00> : vector<8xf32>
    %69 = vector.multi_reduction <add>, %68, %cst_33 [1] : vector<8x128xf32> to vector<8xf32>
    %70 = vector.shape_cast %69 : vector<8xf32> to vector<8x1xf32>
    %71 = vector.broadcast %70 : vector<8x1xf32> to vector<8x128xf32>
    %72 = arith.divf %68, %71 : vector<8x128xf32>
    %c0_34 = arith.constant 0 : index
    %c384_35 = arith.constant 384 : index
    %73 = vector.load %arg7[%c0_34, %c384_35] : memref<8x512xf32, #tpu.memory_space<vmem>>, vector<8x128xf32>
    tpu.vector_store %arg7[%c0_34, %c384_35], %72 {strides = array<i32>} : memref<8x512xf32, #tpu.memory_space<vmem>>, vector<8x128xf32>,
    return
  }
  func.func @transform_0(%arg0: i32) -> (i32, i32) {
    %c0_i32 = arith.constant 0 : i32
    %c0_i32_0 = arith.constant 0 : i32
    return %arg0, %c0_i32 : i32, i32
  }
  func.func @transform_1(%arg0: i32) -> (i32, i32) {
    %c0_i32 = arith.constant 0 : i32
    %c0_i32_0 = arith.constant 0 : i32
    %c0_i32_1 = arith.constant 0 : i32
    return %c0_i32, %c0_i32_0 : i32, i32
  }
  func.func @transform_2(%arg0: i32) -> (i32, i32) {
    %c0_i32 = arith.constant 0 : i32
    %c0_i32_0 = arith.constant 0 : i32
    %c0_i32_1 = arith.constant 0 : i32
    return %c0_i32, %c0_i32_0 : i32, i32
  }
  func.func @transform_3(%arg0: i32) -> (i32, i32) {
    %c0_i32 = arith.constant 0 : i32
    %c0_i32_0 = arith.constant 0 : i32
    %c0_i32_1 = arith.constant 0 : i32
    return %c0_i32, %c0_i32_0 : i32, i32
  }
  func.func @transform_4(%arg0: i32) -> (i32, i32) {
    %c0_i32 = arith.constant 0 : i32
    %c0_i32_0 = arith.constant 0 : i32
    %c0_i32_1 = arith.constant 0 : i32
    return %c0_i32, %c0_i32_0 : i32, i32
  }
  func.func @transform_5(%arg0: i32) -> (i32, i32) {
    %c0_i32 = arith.constant 0 : i32
    %c0_i32_0 = arith.constant 0 : i32
    %c0_i32_1 = arith.constant 0 : i32
    return %c0_i32, %c0_i32_0 : i32, i32
  }
  func.func @transform_6(%arg0: i32) -> (i32, i32) {
    %c0_i32 = arith.constant 0 : i32
    %c0_i32_0 = arith.constant 0 : i32
    return %arg0, %c0_i32 : i32, i32
  }
}

</mosaic_0001>

<bundles_post_ra>
// kernel: categorical_dqn_forward.1
= control target key start
LH: loop header
LB: loop body
LE: loop exit
PB: predicated region body
PF: predicated region fallthrough
CT: control target
= control target key end

     0   :  { %11 = vsyncpa [#allocation3], 0  ;;  %s643_s21 = smov [#allocation2]   ;;  %s784_s0 = inlined_call_operand.vmem [shape: bf16[8,8], index: 0, kind: input, shape index: {}]   ;;  %s785_s1 = inlined_call_operand.hbm [shape: bf16[8,64], index: 1, kind: input, shape index: {}]   ;;  %s786_s2 = inlined_call_operand.vmem [shape: bf16[64,128], index: 2, kind: input, shape index: {}]   ;;  %s787_s3 = inlined_call_operand.vmem [shape: bf16[128,32], index: 3, kind: input, shape index: {}]   ;;  %s788_s4 = inlined_call_operand.vmem [shape: bf16[32,512], index: 4, kind: input, shape index: {}]   ;;  %s789_s5 = inlined_call_operand.vmem [shape: f32[1,896], index: 5, kind: input, shape index: {}]   ;;  %s790_s6 = inlined_call_operand.vmem [shape: f32[8,512], index: 6, kind: output, shape index: {}]  }
   0x1   :  { %s20_s22 = sshll.u32 %s643_s21, 4  ;;  %s619_s25 = scalar_lea.hbm %s785_s1, 64  ;;  %s21_s22 = int_to_ptr.vmem [resolvable:$true] %s20_s22 }
   0x2   :  { %p620_p0 = scmp.ne.s32.totalorder %s785_s1, %s619_s25  ;;  %p623_p1 = scmp.lt.u32.totalorder %s619_s25, %s785_s1 }
   0x4   :  { %p625_p2 = pnand %p623_p1, %p620_p0 }
   0x6   :  { %628 = shalt.err (!%p625_p2)
}
   0x7   :  { %s629_s30 = scalar_lea.vmem %s21_s22, 64  ;;  %p634_p4 = scmp.lt.s32.totalorder %s21_s22, %s21_s22 }
   0x8   :  { %p630_p3 = scmp.ne.s32.totalorder %s21_s22, %s629_s30  ;;  %p635_p5 = scmp.lt.s32.totalorder %s629_s30, %s629_s30 }
   0xa   :  { %p636_p6 = por %p635_p5, %p634_p4 }
   0xc   :  { %p637_p7 = pnand %p636_p6, %p630_p3 }
   0xe   :  { %640 = shalt.err (!%p637_p7)
}
   0xf   :  { %23 = dma.hbm_to_vmem [thread:$0]  %s785_s1, 64, %s21_s22, [#allocation3]  }
  0x10   :  { %641 = dma.done.wait [#allocation3], 64  }
  0x11   :  { %642 = vsyncadd [#allocation3], 4294967232  ;;  %v644_v0 = vmov 0.0   ;;  %vm645_vm0 = vmmov 0   ;;  %vm49_vm1 = vcmask 1043456   ;;  %v579_v3 = vld [vmem:[%s786_s2] sm:$0xff]   ;;  %v303_v49 = vlaneseq }
  0x12   :  { %537 = vmatprep.subr.bf16.mxu0 %v644_v0  ;;  %539 = vmatprep.mubr.msk.bf16.mxu0 %vm645_vm0, %v644_v0  ;;  %v37_v1 = vld [vmem:[#allocation2] sm:$0xf]  ;;  %vm45_vm2 = vcmask 64512   ;;  %v580_v5 = vld [vmem:[%s786_s2 + $0x8] sm:$0xff]   ;;  %v581_v6 = vld [vmem:[%s786_s2 + $0x10] sm:$0xff]   ;;  %vm134_vm3 = vcmask 523264  }
  0x13   :  { %543 = vmatprep.subr.bf16.mxu1 %v644_v0  ;;  %551 = vmatprep.mubr.msk.bf16.mxu1 %vm645_vm0, %v644_v0  ;;  %v51_v2 = vsel %vm49_vm1, %v37_v1, 0  ;;  %v36_v4 = vld [vmem:[%s784_s0] sm:$0xf]  ;;  %v582_v7 = vld [vmem:[%s786_s2 + $0x18] sm:$0xff]   ;;  %v584_v9 = vld [vmem:[%s787_s3 + $0x8] sm:$0xff]   ;;  %v646_v37 = vmov 0  }
  0x14   :  { %538 = vmatpush3.bf16.msra.mxu0 %v51_v2  ;;  %544 = vmatpush3.bf16.msra.mxu1 %v579_v3  ;;  %v583_v8 = vld [vmem:[%s787_s3] sm:$0xff]   ;;  %v585_v10 = vld [vmem:[%s787_s3 + $0x10] sm:$0xff]   ;;  %v586_v11 = vld [vmem:[%s787_s3 + $0x18] sm:$0xff]   ;;  %vm363_vm4 = vcmask 261120   ;;  %v304_v50 = vshrl.u32 %v303_v49, 7 }
  0x15   :  { %555 = vmatprep.subr.bf16.mxu0 %v644_v0  ;;  %545 = vmatprep.subr.bf16.mxu1 %v644_v0  ;;  %v587_v12 = vld [vmem:[%s787_s3 + $0x20] sm:$0xff]   ;;  %v588_v13 = vld [vmem:[%s787_s3 + $0x28] sm:$0xff]   ;;  %v589_v22 = vld [vmem:[%s787_s3 + $0x30] sm:$0xff]  }
  0x16   :  { %v494_v14 = vld [vmem:[%s789_s5] ss:$0 sm:$0xff]  ;;  %v590_v23 = vld [vmem:[%s787_s3 + $0x38] sm:$0xff]   ;;  %v593_v25 = vld [vmem:[%s788_s4 + $0x4] ss:$16 sps:$4 sm:$0xff]   ;;  %v305_v51 = vsub.s32 0, %v304_v50 }
  0x17   :  { %540 = vmatmul.mubr.msk.bf16.vlgmr.msra.gmra.mrb[0].mxu0 %vm45_vm2, %v36_v4  ;;  %v591_v24 = vld [vmem:[%s788_s4] ss:$16 sps:$4 sm:$0xff]   ;;  %v596_v34 = vld [vmem:[%s788_s4 + $0x24] ss:$16 sps:$4 sm:$0xff]   ;;  %v599_v36 = vld [vmem:[%s788_s4 + $0xc] ss:$16 sps:$4 sm:$0xff]  }
  0x18   :  { %571 = vmatprep.mubr.msk.bf16.mxu0 %vm645_vm0, %v644_v0  ;;  %546 = vmatpush3.bf16.msra.mxu1 %v580_v5  ;;  %v496_v26 = vld [vmem:[%s789_s5 + $0x1] ss:$0 sm:$0xff]  ;;  %v502_v38 = vld [vmem:[%s789_s5 + $0x2] ss:$0 sm:$0xff]  ;;  %v597_v45 = vld [vmem:[%s788_s4 + $0x8] ss:$16 sps:$4 sm:$0xff]  }
  0x19   :  { %547 = vmatprep.subr.bf16.mxu1 %v644_v0  ;;  %556 = vmatpush3.bf16.msra.mxu0 %v583_v8  ;;  %v594_v35 = vld [vmem:[%s788_s4 + $0x20] ss:$16 sps:$4 sm:$0xff]   ;;  %v602_v47 = vld [vmem:[%s788_s4 + $0x2c] ss:$16 sps:$4 sm:$0xff]   ;;  %v600_v48 = vld [vmem:[%s788_s4 + $0x28] ss:$16 sps:$4 sm:$0xff]  }
  0x1a   :  { %557 = vmatprep.subr.bf16.mxu0 %v644_v0  ;;  %v301_v52 = vld [vmem:[%s789_s5 + $0x3] sm:$0xf]  ;;  %v309_v54 = vsub.s32 1, %v304_v50  ;;  %v313_v59 = vsub.s32 2, %v304_v50 }
  0x1b   :  { %v306_v53 = vrot.slane %v301_v52, %v305_v51 }
  0x1c   :  { %548 = vmatpush3.bf16.msra.mxu1 %v581_v6  ;;  %v310_v57 = vrot.slane %v301_v52, %v309_v54  ;;  %v314_v63 = vrot.slane %v301_v52, %v313_v59 }
  0x1d   :  { %549 = vmatprep.subr.bf16.mxu1 %v644_v0  ;;  %558 = vmatpush3.bf16.msra.mxu0 %v584_v9 }
  0x1e   :  { %559 = vmatprep.subr.bf16.mxu0 %v644_v0 }
  0x20   :  { %550 = vmatpush3.bf16.msra.mxu1 %v582_v7 }
  0x21   :  { %560 = vmatpush3.bf16.msra.mxu0 %v585_v10  ;;  %367 = vmatprep.subr.bf16.mxu1 %v593_v25 }
  0x22   :  { %561 = vmatprep.subr.bf16.mxu0 %v644_v0 }
  0x25   :  { %562 = vmatpush3.bf16.msra.mxu0 %v586_v11 }
  0x26   :  { %563 = vmatprep.subr.bf16.mxu0 %v644_v0 }
  0x29   :  { %564 = vmatpush3.bf16.msra.mxu0 %v587_v12 }
  0x2a   :  { %565 = vmatprep.subr.bf16.mxu0 %v644_v0 }
  0x2d   :  { %566 = vmatpush3.bf16.msra.mxu0 %v588_v13 }
  0x2e   :  { %567 = vmatprep.subr.bf16.mxu0 %v644_v0 }
  0x31   :  { %568 = vmatpush3.bf16.msra.mxu0 %v589_v22 }
  0x32   :  { %569 = vmatprep.subr.bf16.mxu0 %v644_v0  ;;  %v317_v0 = vsub.s32 3, %v304_v50 }
  0x34   :  { %v318_v3 = vrot.slane %v301_v52, %v317_v0 }
  0x35   :  { %570 = vmatpush3.bf16.msra.mxu0 %v590_v23 }
  0xea   :  { %v87_v15 = vpop.f32.mrb[0].mxu0 }
  0xeb   :  { %v88_v16 = vadd.f32 %v494_v14, %v87_v15  ;;  %v541_v17 = vpop.f32.mrb[1].mxu0 }
  0xec   :  { %v90_v18 = vpop.f32.mrb[2].mxu0 }
  0xed   :  { %v93_v19 = vmax.f32 %v88_v16, 0.0  ;;  %v542_v20 = vpop.f32.mrb[3].mxu0 }
  0xef   :  { %v94_v21 = vpack.c.bf16 %v93_v19, %v93_v19 }
  0xf1   :  { %552 = vmatmul.mubr.msk.bf16.vlgmr.msra.gmra.mrb[0].mxu1 %vm134_vm3, %v94_v21 }
  0xf2   :  { %368 = vmatpush1.bf16.msra.mxu1 %v591_v24  ;;  %399 = vmatprep.mubr.bf16.mxu1 %v646_v37 }
  0xf3   :  { %369 = vmatprep.subr.bf16.mxu1 %v596_v34 }
  0xf6   :  { %370 = vmatpush1.bf16.msra.mxu1 %v594_v35 }
  0xf7   :  { %408 = vmatprep.subr.bf16.mxu1 %v599_v36 }
 0x1c4   :  { %v172_v27 = vpop.f32.mrb[0].mxu1 }
 0x1c5   :  { %v173_v28 = vadd.f32 %v496_v26, %v172_v27  ;;  %v553_v29 = vpop.f32.mrb[1].mxu1 }
 0x1c6   :  { %v175_v30 = vpop.f32.mrb[2].mxu1 }
 0x1c7   :  { %v178_v31 = vmax.f32 %v173_v28, 0.0  ;;  %v554_v32 = vpop.f32.mrb[3].mxu1 }
 0x1c9   :  { %v179_v33 = vpack.c.bf16 %v178_v31, %v178_v31 }
 0x1cb   :  { %572 = vmatmul.mubr.bf16.vlgmr.msra.gmra.mrb[4].mxu0 %v179_v33 }
 0x29e   :  { %v285_v39 = vpop.f32.mrb[4].mxu0 }
 0x29f   :  { %v286_v40 = vadd.f32 %v502_v38, %v285_v39  ;;  %v573_v41 = vpop.f32.mrb[5].mxu0 }
 0x2a0   :  { %v288_v42 = vpop.f32.mrb[6].mxu0 }
 0x2a1   :  { %v291_v43 = vmax.f32 %v286_v40, 0.0  ;;  %v574_v44 = vpop.f32.mrb[7].mxu0 }
 0x2a3   :  { %v292_v46 = vpack.c.bf16 %v291_v43, %v291_v43 }
 0x2a5   :  { %519 = vmatmul.mubr.msk.bf16.vlgmr.msra.gmra.mrb[4].mxu1 %vm363_vm4, %v292_v46 }
 0x2a6   :  { %409 = vmatpush1.bf16.msra.mxu1 %v597_v45  ;;  %440 = vmatprep.mubr.bf16.mxu1 %v646_v37 }
 0x2a7   :  { %410 = vmatprep.subr.bf16.mxu1 %v602_v47 }
 0x2aa   :  { %411 = vmatpush1.bf16.msra.mxu1 %v600_v48 }
 0x2ad   :  { %520 = vmatmul.mubr.msk.bf16.vlgmr.msra.gmra.mrb[8].mxu1 %vm363_vm4, %v292_v46 }
 0x378   :  { %v401_v55 = vpop.f32.mrb[4].mxu1 }
 0x379   :  { %v402_v56 = vadd.f32 %v401_v55, %v306_v53  ;;  %v403_v58 = vpop.f32.mrb[5].mxu1 }
 0x37a   :  { %v405_v60 = vpop.f32.mrb[6].mxu1  ;;  %v404_v62 = vadd.f32 %v403_v58, %v310_v57 }
 0x37b   :  { %v406_v61 = vpop.f32.mrb[7].mxu1  ;;  %449 = vmax.xlane.f32.xlu0 %v402_v56 }
 0x37f   :  { %459 = vmax.xlane.f32.xlu0 %v404_v62 }
 0x380   :  { %v442_v1 = vpop.f32.mrb[8].mxu1 }
 0x381   :  { %v443_v2 = vadd.f32 %v442_v1, %v314_v63  ;;  %v444_v4 = vpop.f32.mrb[9].mxu1 }
 0x382   :  { %v446_v5 = vpop.f32.mrb[10].mxu1  ;;  %v445_v7 = vadd.f32 %v444_v4, %v318_v3 }
 0x383   :  { %v447_v6 = vpop.f32.mrb[11].mxu1  ;;  %469 = vmax.xlane.f32.xlu1 %v443_v2 }
 0x387   :  { %479 = vmax.xlane.f32.xlu1 %v445_v7 }
 0x408   :  { %v450_v8 = vpop.xlane.xlu0 %449 }
 0x409   :  { %v451_v9 = vsub.f32 %v402_v56, %v450_v8 }
 0x40b   :  { %v452_v10 = vmul.f32 1.442695, %v451_v9 }
 0x40c   :  { %v460_v11 = vpop.xlane.xlu0 %459 }
 0x40d   :  { %603 = vpow2.f32 %v452_v10  ;;  %v461_v12 = vsub.f32 %v404_v62, %v460_v11 }
 0x40f   :  { %v462_v13 = vmul.f32 1.442695, %v461_v12 }
 0x410   :  { %v470_v14 = vpop.xlane.xlu1 %469 }
 0x411   :  { %605 = vpow2.f32 %v462_v13  ;;  %v471_v15 = vsub.f32 %v443_v2, %v470_v14 }
 0x413   :  { %v472_v16 = vmul.f32 1.442695, %v471_v15 }
 0x414   :  { %v480_v17 = vpop.xlane.xlu1 %479 }
 0x415   :  { %607 = vpow2.f32 %v472_v16  ;;  %v481_v18 = vsub.f32 %v445_v7, %v480_v17 }
 0x417   :  { %v604_v19 = vpop.eup %603  ;;  %v482_v20 = vmul.f32 1.442695, %v481_v18 }
 0x418   :  { %454 = vadd.xlane.f32.xlu0 %v604_v19 }
 0x419   :  { %609 = vpow2.f32 %v482_v20 }
 0x41b   :  { %v606_v21 = vpop.eup %605 }
 0x41c   :  { %464 = vadd.xlane.f32.xlu1 %v606_v21 }
 0x41f   :  { %v608_v22 = vpop.eup %607 }
 0x420   :  { %474 = vadd.xlane.f32.xlu0 %v608_v22 }
 0x423   :  { %v610_v23 = vpop.eup %609 }
 0x424   :  { %484 = vadd.xlane.f32.xlu1 %v610_v23 }
 0x4a5   :  { %v455_v24 = vpop.xlane.xlu0 %454 }
 0x4a6   :  { %611 = vrcp.f32 %v455_v24 }
 0x4a9   :  { %v465_v25 = vpop.xlane.xlu1 %464 }
 0x4aa   :  { %613 = vrcp.f32 %v465_v25 }
 0x4ad   :  { %v475_v26 = vpop.xlane.xlu0 %474 }
 0x4ae   :  { %615 = vrcp.f32 %v475_v26 }
 0x4b0   :  { %v612_v27 = vpop.eup %611 }
 0x4b1   :  { %v457_v28 = vmul.f32 %v612_v27, %v604_v19  ;;  %v485_v29 = vpop.xlane.xlu1 %484 }
 0x4b2   :  { %617 = vrcp.f32 %v485_v29 }
 0x4b3   :  { %458 = vst [vmem:[%s790_s6] sm:$0xff] %v457_v28 }
 0x4b4   :  { %v614_v30 = vpop.eup %613 }
 0x4b5   :  { %v467_v31 = vmul.f32 %v614_v30, %v606_v21 }
 0x4b7   :  { %468 = vst [vmem:[%s790_s6 + $0x8] sm:$0xff] %v467_v31 }
 0x4b8   :  { %v616_v32 = vpop.eup %615 }
 0x4b9   :  { %v477_v33 = vmul.f32 %v616_v32, %v608_v22 }
 0x4bb   :  { %478 = vst [vmem:[%s790_s6 + $0x10] sm:$0xff] %v477_v33 }
 0x4bc   :  { %v618_v34 = vpop.eup %617 }
 0x4bd   :  { %v487_v35 = vmul.f32 %v618_v34, %v610_v23 }
 0x4bf   :  { %488 = vst [vmem:[%s790_s6 + $0x18] sm:$0xff] %v487_v35 }
 0x4c0   :  { %493 = vsyncpa [#allocation3], 1 }

</bundles_post_ra>
